<compile_context>
chip_gen: v6e
topology: v6e:2x2x1
jax: 0.10.0
libtpu: 0.0.40
codegen_flags: <defaults>
</compile_context>

<pallas_src>
import jax
import jax.numpy as jnp
from jax import lax
from jax.experimental import pallas as pl
from jax.experimental.pallas import tpu as pltpu


def _round_up(x, m):
    return -(-x // m) * m


def _dice_partials(p3, t3, *, tile_n, tile_s, split, cps, s_arr, ragged):
    """pallas_call producing (split, N, 2, 128) f32 partials.

    partials[:, i, 0, :] lane-sums to sum(pred_i * target_i)
    partials[:, i, 1, :] lane-sums to sum(pred_i) + sum(target_i)
    """
    n = p3.shape[0]
    n_blocks = -(-n // tile_n)
    itemsize = p3.dtype.itemsize
    d_arr = s_arr * 128

    def kernel(p_ref, t_ref, out_ref, inter_acc, denom_acc):
        k = pl.program_id(2)

        @pl.when(k == 0)
        def _init():
            inter_acc[...] = jnp.zeros_like(inter_acc)
            denom_acc[...] = jnp.zeros_like(denom_acc)

        p = p_ref[...].astype(jnp.float32)   # (tile_n, tile_s, 128)
        t = t_ref[...].astype(jnp.float32)

        if ragged:
            # Last chunk reads past the (minimally padded) array: mask garbage
            # rows before accumulating.  A couple of VPU ops, hidden under DMA.
            c = pl.program_id(1)
            row = lax.broadcasted_iota(jnp.int32, (tile_n, tile_s, 128), 1)
            start = (c * cps + k) * tile_s
            valid = (start + row) < s_arr
            p = jnp.where(valid, p, 0.0)
            t = jnp.where(valid, t, 0.0)

        # Fold into whole-vreg (8,128) groups: pure VALU adds, tiny accumulators.
        grp = (tile_n, tile_s // 8, 8, 128)
        inter_acc[...] += jnp.sum((p * t).reshape(grp), axis=1)
        denom_acc[...] += jnp.sum((p + t).reshape(grp), axis=1)

        @pl.when(k == cps - 1)
        def _finalize():
            # One sublane reduce per sample block; lane reduce + dice formula
            # happen outside the kernel (lane-dense, unmasked 128-wide stores).
            out_ref[0, :, 0:1, :] = jnp.sum(inter_acc[...], axis=1, keepdims=True)
            out_ref[0, :, 1:2, :] = jnp.sum(denom_acc[...], axis=1, keepdims=True)

    return pl.pallas_call(
        kernel,
        out_shape=jax.ShapeDtypeStruct((split, n, 2, 128), jnp.float32),
        grid_spec=pltpu.PrefetchScalarGridSpec(
            num_scalar_prefetch=0,
            grid=(n_blocks, split, cps),
            in_specs=[
                pl.BlockSpec((tile_n, tile_s, 128),
                             lambda i, c, k: (i, c * cps + k, 0)),
                pl.BlockSpec((tile_n, tile_s, 128),
                             lambda i, c, k: (i, c * cps + k, 0)),
            ],
            out_specs=pl.BlockSpec((1, tile_n, 2, 128),
                                   lambda i, c, k: (c, i, 0, 0)),
            scratch_shapes=[
                pltpu.VMEM((tile_n, 8, 128), jnp.float32),
                pltpu.VMEM((tile_n, 8, 128), jnp.float32),
            ],
        ),
        compiler_params=pltpu.CompilerParams(
            dimension_semantics=("parallel", "parallel", "arbitrary"),
            vmem_limit_bytes=32 * 1024 * 1024,
        ),
        cost_estimate=pl.CostEstimate(
            flops=3 * n * d_arr,
            transcendentals=0,
            bytes_accessed=2 * n * d_arr * itemsize + split * n * 2 * 128 * 4,
        ),
    )(p3, t3)


def dice_loss(pred, target, *, tile_s=None, tile_n=None, split=None,
              block_bytes=2 * 1024 * 1024):
    """Pallas implementation of DiceLoss.forward (smooth = 1)."""
    assert pred.shape == target.shape
    n = pred.shape[0]
    target = target.astype(pred.dtype)
    p2 = pred.reshape(n, -1)
    t2 = target.reshape(n, -1)
    d = p2.shape[1]

    itemsize = p2.dtype.itemsize
    sub = 8 * max(1, 4 // itemsize)      # min sublane tile: f32 -> 8, bf16 -> 16, i8 -> 32

    # Factor D into (S, 128) lanes.  Pad only to the next sublane boundary
    # (sum-preserving zeros); skipped entirely when already aligned.
    s_arr = _round_up(max(1, -(-d // 128)), sub)
    d_arr = s_arr * 128
    if d_arr != d:
        p2 = jnp.pad(p2, ((0, 0), (0, d_arr - d)))
        t2 = jnp.pad(t2, ((0, 0), (0, d_arr - d)))
    p3 = p2.reshape(n, s_arr, 128)
    t3 = t2.reshape(n, s_arr, 128)

    # ~block_bytes per input block, lane/sublane dense, dtype-aware row count.
    budget_rows = max(sub, (block_bytes // (128 * itemsize)) // sub * sub)
    if tile_s is None:
        tile_s = budget_rows
    tile_s = min(max(sub, (tile_s // sub) * sub), s_arr)
    chunks = -(-s_arr // tile_s)
    ragged = (s_arr % tile_s) != 0

    # Batch samples per grid step when a whole sample fits in one block.
    if tile_n is None:
        tile_n = 1 if chunks > 1 else min(n, max(1, budget_rows // s_arr), 256)
    tile_n = max(1, min(tile_n, n))
    n_blocks = -(-n // tile_n)

    # Split the reduction axis in two parallel halves so both v7x TensorCores get
    # work when there is only one sample block; no-op on 1-TC chips.
    if split is None:
        split = 2 if (n_blocks == 1 and chunks >= 2 and chunks % 2 == 0) else 1
    if split < 1 or chunks % split != 0:
        split = 1
    cps = chunks // split

    partials = _dice_partials(p3, t3, tile_n=tile_n, tile_s=tile_s, split=split,
                              cps=cps, s_arr=s_arr, ragged=ragged)

    # Tiny epilogue in plain JAX: combine split halves, lane reduce, dice formula.
    sums = jnp.sum(partials, axis=(0, 3))        # (N, 2)
    inter = sums[:, 0]                           # sum(pred * target)
    denom = sums[:, 1]                           # sum(pred) + sum(target)
    smooth = jnp.float32(1.0)
    dice_score = (2.0 * inter + smooth) / (denom + smooth)
    return 1.0 - jnp.sum(dice_score) / jnp.float32(n)


def _dice_loss_ref(pred, target):
    """Pure-JAX reference mirroring the PyTorch forward exactly."""
    smooth = 1.0
    n = pred.shape[0]
    p = pred.reshape(n, -1).astype(jnp.float32)
    t = target.reshape(n, -1).astype(jnp.float32)
    inter = (p * t).sum(axis=1)
    score = (2.0 * inter + smooth) / (p.sum(axis=1) + t.sum(axis=1) + smooth)
    return 1.0 - score.sum() / n


if __name__ == "__main__":
    key = jax.random.PRNGKey(0)
    ks = jax.random.split(key, 6)

    # 1) Module-typical NCHW f32 input (batch=2, channels=4, spatial=16x16).
    pred1 = jax.nn.sigmoid(jax.random.normal(ks[0], (2, 4, 16, 16), dtype=jnp.float32))
    targ1 = (jax.random.uniform(ks[1], (2, 4, 16, 16)) > 0.5).astype(jnp.float32)
    out1 = jax.block_until_ready(dice_loss(pred1, targ1))
    ref1 = jax.block_until_ready(_dice_loss_ref(pred1, targ1))
    assert jnp.allclose(out1, ref1, rtol=1e-5, atol=1e-5), (out1, ref1)

    # 2) Multi-chunk reduction + ragged tail mask + 2-way reduction split (v7x path).
    pred2 = jax.nn.sigmoid(jax.random.normal(ks[2], (1, 8, 64, 64), dtype=jnp.float32))
    targ2 = (jax.random.uniform(ks[3], (1, 8, 64, 64)) > 0.5).astype(jnp.float32)
    out2 = jax.block_until_ready(dice_loss(pred2, targ2, tile_s=48))
    ref2 = jax.block_until_ready(_dice_loss_ref(pred2, targ2))
    assert jnp.allclose(out2, ref2, rtol=1e-5, atol=1e-5), (out2, ref2)

    # 3) bf16 inputs, D not a multiple of 128 (minimal-pad path), N-batched step.
    pred3 = jax.nn.sigmoid(
        jax.random.normal(ks[4], (3, 5, 9, 7), dtype=jnp.float32)).astype(jnp.bfloat16)
    targ3 = (jax.random.uniform(ks[5], (3, 5, 9, 7)) > 0.5).astype(jnp.bfloat16)
    out3 = jax.block_until_ready(dice_loss(pred3, targ3))
    ref3 = jax.block_until_ready(
        _dice_loss_ref(pred3.astype(jnp.float32), targ3.astype(jnp.float32)))
    assert jnp.allclose(out3, ref3, rtol=1e-4, atol=1e-4), (out3, ref3)

    print("KERNEL_OK")
</pallas_src>

<mosaic_0001>
module attributes {stable_mosaic.version = 11 : i64} {
  func.func @kernel(%arg0: i32, %arg1: i32, %arg2: i32, %arg3: memref<2x8x128xf32, #tpu.memory_space<vmem>>, %arg4: memref<2x8x128xf32, #tpu.memory_space<vmem>>, %arg5: memref<1x2x2x128xf32, #tpu.memory_space<vmem>>, %arg6: memref<2x8x128xf32, #tpu.memory_space<vmem>>, %arg7: memref<2x8x128xf32, #tpu.memory_space<vmem>>) attributes {dimension_semantics = [#tpu.dimension_semantics<parallel>, #tpu.dimension_semantics<parallel>, #tpu.dimension_semantics<arbitrary>], iteration_bounds = array<i64: 1, 1, 1>, scalar_prefetch = 0 : i64, scratch_operands = 2 : i64, tpu.core_type = #tpu.core_type<tc>, window_params = [{transform_indices = @transform_0, window_bounds = array<i64: 2, 8, 128>}, {transform_indices = @transform_1, window_bounds = array<i64: 2, 8, 128>}, {transform_indices = @transform_2, window_bounds = array<i64: 1, 2, 2, 128>}]} {
    %c0_i32 = arith.constant 0 : i32
    %0 = arith.cmpi eq, %arg2, %c0_i32 : i32
    %1 = arith.extui %0 : i1 to i32
    %c0_i32_0 = arith.constant 0 : i32
    %2 = arith.cmpi ne, %1, %c0_i32_0 : i32
    scf.if %2 {
      %cst_21 = arith.constant 0.000000e+00 : f32
      %20 = vector.broadcast %cst_21 : f32 to vector<2x8x128xf32>
      %c0_22 = arith.constant 0 : index
      %c0_23 = arith.constant 0 : index
      %c0_24 = arith.constant 0 : index
      %21 = vector.load %arg6[%c0_22, %c0_23, %c0_24] : memref<2x8x128xf32, #tpu.memory_space<vmem>>, vector<2x8x128xf32>
      tpu.vector_store %arg6[%c0_22, %c0_23, %c0_24], %20 {strides = array<i32>} : memref<2x8x128xf32, #tpu.memory_space<vmem>>, vector<2x8x128xf32>,
      %cst_25 = arith.constant 0.000000e+00 : f32
      %22 = vector.broadcast %cst_25 : f32 to vector<2x8x128xf32>
      %c0_26 = arith.constant 0 : index
      %c0_27 = arith.constant 0 : index
      %c0_28 = arith.constant 0 : index
      %23 = vector.load %arg7[%c0_26, %c0_27, %c0_28] : memref<2x8x128xf32, #tpu.memory_space<vmem>>, vector<2x8x128xf32>
      tpu.vector_store %arg7[%c0_26, %c0_27, %c0_28], %22 {strides = array<i32>} : memref<2x8x128xf32, #tpu.memory_space<vmem>>, vector<2x8x128xf32>,
    } else {
    }
    %c0 = arith.constant 0 : index
    %c0_1 = arith.constant 0 : index
    %c0_2 = arith.constant 0 : index
    %3 = vector.load %arg3[%c0, %c0_1, %c0_2] : memref<2x8x128xf32, #tpu.memory_space<vmem>>, vector<2x8x128xf32>
    %c0_3 = arith.constant 0 : index
    %c0_4 = arith.constant 0 : index
    %c0_5 = arith.constant 0 : index
    %4 = vector.load %arg4[%c0_3, %c0_4, %c0_5] : memref<2x8x128xf32, #tpu.memory_space<vmem>>, vector<2x8x128xf32>
    %c0_6 = arith.constant 0 : index
    %c0_7 = arith.constant 0 : index
    %c0_8 = arith.constant 0 : index
    %5 = vector.load %arg6[%c0_6, %c0_7, %c0_8] : memref<2x8x128xf32, #tpu.memory_space<vmem>>, vector<2x8x128xf32>
    %6 = arith.mulf %3, %4 : vector<2x8x128xf32>
    %7 = vector.shape_cast %6 : vector<2x8x128xf32> to vector<2x1x8x128xf32>
    %cst = arith.constant dense<0.000000e+00> : vector<2x8x128xf32>
    %8 = vector.multi_reduction <add>, %7, %cst [1] : vector<2x1x8x128xf32> to vector<2x8x128xf32>
    %9 = arith.addf %5, %8 : vector<2x8x128xf32>
    %c0_9 = arith.constant 0 : index
    %c0_10 = arith.constant 0 : index
    %c0_11 = arith.constant 0 : index
    %10 = vector.load %arg6[%c0_9, %c0_10, %c0_11] : memref<2x8x128xf32, #tpu.memory_space<vmem>>, vector<2x8x128xf32>
    tpu.vector_store %arg6[%c0_9, %c0_10, %c0_11], %9 {strides = array<i32>} : memref<2x8x128xf32, #tpu.memory_space<vmem>>, vector<2x8x128xf32>,
    %c0_12 = arith.constant 0 : index
    %c0_13 = arith.constant 0 : index
    %c0_14 = arith.constant 0 : index
    %11 = vector.load %arg7[%c0_12, %c0_13, %c0_14] : memref<2x8x128xf32, #tpu.memory_space<vmem>>, vector<2x8x128xf32>
    %12 = arith.addf %3, %4 : vector<2x8x128xf32>
    %13 = vector.shape_cast %12 : vector<2x8x128xf32> to vector<2x1x8x128xf32>
    %cst_15 = arith.constant dense<0.000000e+00> : vector<2x8x128xf32>
    %14 = vector.multi_reduction <add>, %13, %cst_15 [1] : vector<2x1x8x128xf32> to vector<2x8x128xf32>
    %15 = arith.addf %11, %14 : vector<2x8x128xf32>
    %c0_16 = arith.constant 0 : index
    %c0_17 = arith.constant 0 : index
    %c0_18 = arith.constant 0 : index
    %16 = vector.load %arg7[%c0_16, %c0_17, %c0_18] : memref<2x8x128xf32, #tpu.memory_space<vmem>>, vector<2x8x128xf32>
    tpu.vector_store %arg7[%c0_16, %c0_17, %c0_18], %15 {strides = array<i32>} : memref<2x8x128xf32, #tpu.memory_space<vmem>>, vector<2x8x128xf32>,
    %c0_i32_19 = arith.constant 0 : i32
    %17 = arith.cmpi eq, %arg2, %c0_i32_19 : i32
    %18 = arith.extui %17 : i1 to i32
    %c0_i32_20 = arith.constant 0 : i32
    %19 = arith.cmpi ne, %18, %c0_i32_20 : i32
    scf.if %19 {
      %c0_21 = arith.constant 0 : index
      %c0_22 = arith.constant 0 : index
      %c0_23 = arith.constant 0 : index
      %20 = vector.load %arg6[%c0_21, %c0_22, %c0_23] : memref<2x8x128xf32, #tpu.memory_space<vmem>>, vector<2x8x128xf32>
      %cst_24 = arith.constant dense<0.000000e+00> : vector<2x128xf32>
      %21 = vector.multi_reduction <add>, %20, %cst_24 [1] : vector<2x8x128xf32> to vector<2x128xf32>
      %22 = vector.shape_cast %21 : vector<2x128xf32> to vector<2x1x128xf32>
      %c0_25 = arith.constant 0 : index
      %c0_26 = arith.constant 0 : index
      %c0_27 = arith.constant 0 : index
      %c0_28 = arith.constant 0 : index
      %23 = vector.load %arg5[%c0_25, %c0_26, %c0_27, %c0_28] : memref<1x2x2x128xf32, #tpu.memory_space<vmem>>, vector<1x2x1x128xf32>
      %24 = vector.shape_cast %23 : vector<1x2x1x128xf32> to vector<2x1x128xf32>
      %25 = vector.shape_cast %22 : vector<2x1x128xf32> to vector<1x2x1x128xf32>
      tpu.vector_store %arg5[%c0_25, %c0_26, %c0_27, %c0_28], %25 {strides = array<i32>} : memref<1x2x2x128xf32, #tpu.memory_space<vmem>>, vector<1x2x1x128xf32>,
      %c0_29 = arith.constant 0 : index
      %c0_30 = arith.constant 0 : index
      %c0_31 = arith.constant 0 : index
      %26 = vector.load %arg7[%c0_29, %c0_30, %c0_31] : memref<2x8x128xf32, #tpu.memory_space<vmem>>, vector<2x8x128xf32>
      %cst_32 = arith.constant dense<0.000000e+00> : vector<2x128xf32>
      %27 = vector.multi_reduction <add>, %26, %cst_32 [1] : vector<2x8x128xf32> to vector<2x128xf32>
      %28 = vector.shape_cast %27 : vector<2x128xf32> to vector<2x1x128xf32>
      %c0_33 = arith.constant 0 : index
      %c0_34 = arith.constant 0 : index
      %c1 = arith.constant 1 : index
      %c0_35 = arith.constant 0 : index
      %29 = vector.load %arg5[%c0_33, %c0_34, %c1, %c0_35] : memref<1x2x2x128xf32, #tpu.memory_space<vmem>>, vector<1x2x1x128xf32>
      %30 = vector.shape_cast %29 : vector<1x2x1x128xf32> to vector<2x1x128xf32>
      %31 = vector.shape_cast %28 : vector<2x1x128xf32> to vector<1x2x1x128xf32>
      tpu.vector_store %arg5[%c0_33, %c0_34, %c1, %c0_35], %31 {strides = array<i32>} : memref<1x2x2x128xf32, #tpu.memory_space<vmem>>, vector<1x2x1x128xf32>,
    } else {
    }
    return
  }
  func.func @transform_0(%arg0: i32, %arg1: i32, %arg2: i32) -> (i32, i32, i32) {
    %c1_i32 = arith.constant 1 : i32
    %0 = arith.muli %arg1, %c1_i32 : i32
    %1 = arith.addi %0, %arg2 : i32
    %c0_i32 = arith.constant 0 : i32
    %c0_i32_0 = arith.constant 0 : i32
    return %arg0, %1, %c0_i32 : i32, i32, i32
  }
  func.func @transform_1(%arg0: i32, %arg1: i32, %arg2: i32) -> (i32, i32, i32) {
    %c1_i32 = arith.constant 1 : i32
    %0 = arith.muli %arg1, %c1_i32 : i32
    %1 = arith.addi %0, %arg2 : i32
    %c0_i32 = arith.constant 0 : i32
    %c0_i32_0 = arith.constant 0 : i32
    return %arg0, %1, %c0_i32 : i32, i32, i32
  }
  func.func @transform_2(%arg0: i32, %arg1: i32, %arg2: i32) -> (i32, i32, i32, i32) {
    %c0_i32 = arith.constant 0 : i32
    %c0_i32_0 = arith.constant 0 : i32
    %c0_i32_1 = arith.constant 0 : i32
    return %arg1, %arg0, %c0_i32, %c0_i32_0 : i32, i32, i32, i32
  }
}

</mosaic_0001>

<bundles_post_ra>
// kernel: tpu_custom_call.1
= control target key start
LH: loop header
LB: loop body
LE: loop exit
PB: predicated region body
PF: predicated region fallthrough
CT: control target
= control target key end

     0   :  { %7 = vsyncpa [#allocation5], 0  ;;  %s237_s0 = inlined_call_operand.hbm [shape: f32[2,8,128], index: 0, kind: input, shape index: {}]   ;;  %s238_s1 = inlined_call_operand.hbm [shape: f32[2,8,128], index: 1, kind: input, shape index: {}]   ;;  %s239_s2 = inlined_call_operand.hbm [shape: f32[1,2,2,128], index: 2, kind: output, shape index: {}]  }
   0x1   :  { %8 = vsyncpa [#allocation8], 0 }
   0x2   :  { %9 = vsyncpa [#allocation6], 0  ;;  %s206_s9 = smov [#allocation4]  }
   0x3   :  { %s18_s10 = sshll.u32 %s206_s9, 4  ;;  %s19_s10 = int_to_ptr.vmem [resolvable:$true] %s18_s10 }
   0x4   :  { %s148_s11 = scalar_lea.vmem %s19_s10, 256  ;;  %p153_p1 = scmp.lt.s32.totalorder %s19_s10, %s19_s10 }
   0x5   :  { %p149_p0 = scmp.ne.s32.totalorder %s19_s10, %s148_s11  ;;  %p154_p2 = scmp.lt.s32.totalorder %s148_s11, %s148_s11 }
   0x7   :  { %p155_p3 = por %p154_p2, %p153_p1 }
   0x9   :  { %p156_p4 = pnand %p155_p3, %p149_p0 }
   0xb   :  { %159 = shalt.err (!%p156_p4)
}
   0xc   :  { %s207_s12 = smov 128   ;;  %s208_s13 = smov 8  }
   0xd   :  { %24 = dma.hbm_to_vmem [thread:$0]  %s237_s0, 256, %s19_s10, [#allocation5], %s207_s12, %s207_s12, %s208_s13  }
   0xe   :  { %s209_s16 = smov [#allocation7]  }
   0xf   :  { %s33_s17 = sshll.u32 %s209_s16, 4  ;;  %s34_s17 = int_to_ptr.vmem [resolvable:$true] %s33_s17 }
  0x10   :  { %s168_s18 = scalar_lea.vmem %s34_s17, 256  ;;  %p173_p6 = scmp.lt.s32.totalorder %s34_s17, %s34_s17 }
  0x11   :  { %p169_p5 = scmp.ne.s32.totalorder %s34_s17, %s168_s18  ;;  %p174_p7 = scmp.lt.s32.totalorder %s168_s18, %s168_s18 }
  0x13   :  { %p175_p8 = por %p174_p7, %p173_p6 }
  0x15   :  { %p176_p9 = pnand %p175_p8, %p169_p5 }
  0x17   :  { %179 = shalt.err (!%p176_p9)
}
  0x18   :  { %39 = dma.hbm_to_vmem [thread:$0]  %s238_s1, 256, %s34_s17, [#allocation8], %s207_s12, %s207_s12, %s208_s13  }
  0x19   :  { %200 = dma.done.wait [#allocation5], 256  }
  0x1a   :  { %201 = vsyncadd [#allocation5], 4294967040 }
  0x1b   :  { %202 = dma.done.wait [#allocation8], 256  }
  0x1c   :  { %203 = vsyncadd [#allocation8], 4294967040  ;;  %v56_v0 = vld [vmem:[#allocation4] sm:$0xff]  ;;  %v58_v1 = vld [vmem:[#allocation7] sm:$0xff]  ;;  %s210_s0 = smov [#allocation9]  }
  0x1d   :  { %v57_v2 = vld [vmem:[#allocation4 + $0x8] sm:$0xff]  ;;  %v62_v3 = vmul.f32 %v58_v1, %v56_v0  ;;  %v59_v4 = vld [vmem:[#allocation7 + $0x8] sm:$0xff]  ;;  %v72_v5 = vadd.f32 %v58_v1, %v56_v0  ;;  %s120_s1 = sshll.u32 %s210_s0, 4  ;;  %s121_s1 = int_to_ptr.vmem [resolvable:$true] %s120_s1 }
  0x1e   :  { %v63_v6 = vmul.f32 %v59_v4, %v57_v2  ;;  %v73_v7 = vadd.f32 %v59_v4, %v57_v2  ;;  %s180_s21 = scalar_lea.vmem %s121_s1, 64  ;;  %p185_p11 = scmp.lt.s32.totalorder %s121_s1, %s121_s1 }
  0x1f   :  { %v85_v8 = vrot.slane %v62_v3, 4  ;;  %v101_v9 = vrot.slane %v72_v5, 4  ;;  %p181_p10 = scmp.ne.s32.totalorder %s121_s1, %s180_s21  ;;  %p186_p12 = scmp.lt.s32.totalorder %s180_s21, %s180_s21 }
  0x20   :  { %v91_v10 = vrot.slane %v63_v6, 4  ;;  %v107_v11 = vrot.slane %v73_v7, 4 }
  0x21   :  { %v86_v12 = vadd.f32 %v85_v8, %v62_v3  ;;  %v102_v13 = vadd.f32 %v101_v9, %v72_v5  ;;  %p187_p13 = por %p186_p12, %p185_p11 }
  0x22   :  { %v92_v14 = vadd.f32 %v91_v10, %v63_v6  ;;  %v108_v15 = vadd.f32 %v107_v11, %v73_v7 }
  0x23   :  { %v87_v16 = vrot.slane %v86_v12, 2  ;;  %v103_v17 = vrot.slane %v102_v13, 2  ;;  %p188_p0 = pnand %p187_p13, %p181_p10 }
  0x24   :  { %v93_v18 = vrot.slane %v92_v14, 2  ;;  %v109_v19 = vrot.slane %v108_v15, 2 }
  0x25   :  { %v88_v20 = vadd.f32 %v87_v16, %v86_v12  ;;  %v104_v21 = vadd.f32 %v103_v17, %v102_v13 }
  0x26   :  { %v94_v22 = vadd.f32 %v93_v18, %v92_v14  ;;  %v110_v23 = vadd.f32 %v109_v19, %v108_v15 }
  0x27   :  { %v89_v24 = vrot.slane %v88_v20, 1  ;;  %v105_v25 = vrot.slane %v104_v21, 1 }
  0x28   :  { %v95_v26 = vrot.slane %v94_v22, 1  ;;  %v111_v27 = vrot.slane %v110_v23, 1 }
  0x29   :  { %v90_v28 = vadd.f32 %v89_v24, %v88_v20  ;;  %v106_v29 = vadd.f32 %v105_v25, %v104_v21 }
  0x2a   :  { %v96_v30 = vadd.f32 %v95_v26, %v94_v22  ;;  %v112_v31 = vadd.f32 %v111_v27, %v110_v23 }
  0x2b   :  { %97 = vst [vmem:[#allocation9] sm:$0x1] %v90_v28  ;;  %113 = vst [vmem:[#allocation9 + $0x1] sm:$0x1] %v106_v29 }
  0x2c   :  { %98 = vst [vmem:[#allocation9 + $0x2] sm:$0x1] %v96_v30  ;;  %114 = vst [vmem:[#allocation9 + $0x3] sm:$0x1] %v112_v31 }
  0x2d   :  { %191 = shalt.err (!%p188_p0)
}
  0x2e   :  { %s211_s22 = smov 32   ;;  %s212_s23 = smov 2  }
  0x2f   :  { %126 = dma.vmem_to_hbm [thread:$0]  %s121_s1, 64, %s239_s2, [#allocation6], %s211_s22, %s211_s22, %s212_s23  }
  0x30   :  { %204 = dma.done.wait [#allocation6], 64  }
  0x31   :  { %205 = vsyncadd [#allocation6], 4294967232 }
  0x32   :  { %130 = vsyncpa [#allocation5], 1 }
  0x33   :  { %131 = vsyncpa [#allocation8], 1 }
  0x34   :  { %132 = vsyncpa [#allocation6], 1 }

</bundles_post_ra>
